<compile_context>
chip_gen: v6e
topology: v6e:2x2x1
jax: 0.10.0
libtpu: 0.0.40
codegen_flags: <defaults>
</compile_context>

<pallas_src>
import numpy as np
import jax
import jax.numpy as jnp
from jax.experimental import pallas as pl
from jax.experimental.pallas import tpu as pltpu


# ---------------------------------------------------------------------------
# Standard JPEG luminance quantization table (transposed, as in DiffJPEG).
# ---------------------------------------------------------------------------
_Y_TABLE = np.array(
    [[16, 11, 10, 16, 24, 40, 51, 61],
     [12, 12, 14, 19, 26, 58, 60, 55],
     [14, 13, 16, 24, 40, 57, 69, 56],
     [14, 17, 22, 29, 51, 87, 80, 62],
     [18, 22, 37, 56, 68, 109, 103, 77],
     [24, 35, 55, 64, 81, 104, 113, 92],
     [49, 64, 78, 87, 103, 121, 120, 101],
     [72, 92, 95, 98, 112, 100, 103, 99]],
    dtype=np.float32).T  # (8, 8)

_LANE = 128  # one vreg lane row = 2 contiguous 8x8 blocks (f32)


def _pick_tiling():
    """Per-generation (max_tile_rows, vmem_limit_bytes) choice."""
    kind = ""
    try:
        kind = jax.devices()[0].device_kind.lower()
    except Exception:
        pass
    if "v7" in kind:
        # 16384 rows * 128 lanes * 4 B = 8 MiB tiles; double-buffered in+out
        # = 32 MiB > default 32 MiB scoped limit -> raise it explicitly.
        return 16384, 48 << 20
    if "v6" in kind:
        # 4 MiB tiles; 16 MiB double-buffered fits the 32 MiB default scope.
        return 8192, None
    # v5e / unknown: 2 MiB tiles stay well inside the 16 MiB default scope.
    return 4096, None


# ---------------------------------------------------------------------------
# Kernel: lane-dense elementwise multiply by the resident scaled table.
# ---------------------------------------------------------------------------
def _y_dequantize_kernel(img_ref, table_ref, out_ref):
    # img_ref: (tile_rows, 128) input dtype; table_ref: (8, 128) f32 (one vreg).
    x = img_ref[...].astype(jnp.float32)
    out_ref[...] = (x * table_ref[0:1, :]).astype(out_ref.dtype)


def y_dequantize(image: jax.Array, factor=1.0, *,
                 out_dtype=jnp.float32, donate: bool = False) -> jax.Array:
    """JPEG Y-channel dequantization: image * (y_table * factor).

    Args:
      image: (..., 8, 8) array of quantized DCT blocks (DiffJPEG layout, e.g.
        (batch, num_blocks, 8, 8)).  Any numeric dtype; cast to f32 in-kernel.
      factor: compression factor (Python or traced scalar).
      out_dtype: output dtype (float32 by default; bf16 halves write traffic).
      donate: alias the input buffer into the output (only applied when the
        dtypes match and no padding is needed).
    Returns:
      Array of the same shape as `image`, dtype `out_dtype`.
    """
    orig_shape = image.shape
    assert orig_shape[-2:] == (8, 8), "trailing dims must be 8x8 DCT blocks"

    n_elems = int(np.prod(orig_shape))     # multiple of 64 by construction
    rows = pl.cdiv(n_elems, _LANE)         # 128-lane rows needed
    n_total = rows * _LANE
    needs_pad = (n_total != n_elems)       # only for an odd number of blocks

    # Flatten to a lane-dense 2D slab. reshape of a row-major array is free.
    flat = image.reshape(-1)
    if needs_pad:
        # Rare path: pad only to the next 128-lane boundary (not tile multiple).
        flat = jnp.pad(flat, (0, n_total - n_elems))
    x2d = flat.reshape(rows, _LANE)

    # Tile rows: multiple of 8 (sublane), capped per-generation, and capped at
    # ~rows/2 so the grid has >=2 steps whenever possible (feeds both v7x TCs).
    max_tile_rows, vmem_limit = _pick_tiling()
    half_rows = ((pl.cdiv(rows, 2) + 7) // 8) * 8
    tile_rows = max(8, min(max_tile_rows, half_rows))
    grid = (pl.cdiv(rows, tile_rows),)     # Pallas masks the ragged last block

    # (8, 128) f32 vreg multiplier: two copies of the flattened 8x8 table,
    # pre-scaled by `factor` (traceable), broadcast to a full vreg.
    f32_factor = jnp.asarray(factor, jnp.float32)
    table_row = jnp.tile(jnp.asarray(_Y_TABLE, jnp.float32).reshape(-1), 2) * f32_factor
    table_vreg = jnp.broadcast_to(table_row.reshape(1, _LANE), (8, _LANE))

    cp_kwargs = dict(dimension_semantics=("parallel",))
    if vmem_limit is not None:
        cp_kwargs["vmem_limit_bytes"] = vmem_limit

    out_dtype = jnp.dtype(out_dtype)
    cost = pl.CostEstimate(
        flops=n_total,
        transcendentals=0,
        bytes_accessed=n_total * (x2d.dtype.itemsize + out_dtype.itemsize),
    )

    alias = {}
    if donate and (not needs_pad) and x2d.dtype == out_dtype:
        alias = {0: 0}   # reuse the input HBM buffer as the output

    out2d = pl.pallas_call(
        _y_dequantize_kernel,
        out_shape=jax.ShapeDtypeStruct((rows, _LANE), out_dtype),
        grid=grid,
        in_specs=[
            pl.BlockSpec((tile_rows, _LANE), lambda i: (i, 0)),
            pl.BlockSpec((8, _LANE), lambda i: (0, 0)),   # resident constant
        ],
        out_specs=pl.BlockSpec((tile_rows, _LANE), lambda i: (i, 0)),
        compiler_params=pltpu.CompilerParams(**cp_kwargs),
        cost_estimate=cost,
        input_output_aliases=alias,
    )(x2d, table_vreg)

    if needs_pad:
        return out2d.reshape(-1)[:n_elems].reshape(orig_shape)
    return out2d.reshape(orig_shape)


if __name__ == "__main__":
    key = jax.random.PRNGKey(0)
    table_f32 = jnp.asarray(_Y_TABLE, jnp.float32)

    # Test 1: batch=2, 16 blocks of 8x8 quantized DCT coefficients
    # (a 32x32 Y plane after block splitting + quantize).  Even block count
    # -> zero-copy wrapper path, grid of 2 steps.
    x = jnp.round(jax.random.normal(key, (2, 16, 8, 8), dtype=jnp.float32) * 8.0)
    factor = 1.0
    out = jax.block_until_ready(y_dequantize(x, factor=factor))
    ref = x.astype(jnp.float32) * (table_f32 * jnp.float32(factor))[None, None]
    np.testing.assert_allclose(np.asarray(out), np.asarray(ref), atol=0.0, rtol=0.0)

    # Test 2: odd block count (exercises the 128-lane padding path) and a
    # non-unit, traced-friendly factor.
    x2 = jnp.round(jax.random.normal(jax.random.PRNGKey(1), (1, 3, 8, 8),
                                     dtype=jnp.float32) * 8.0)
    factor2 = 0.75
    out2 = jax.block_until_ready(y_dequantize(x2, factor=jnp.float32(factor2)))
    ref2 = x2.astype(jnp.float32) * (table_f32 * jnp.float32(factor2))[None, None]
    np.testing.assert_allclose(np.asarray(out2), np.asarray(ref2), rtol=1e-6)

    print("KERNEL_OK")
</pallas_src>

<mosaic_0001>
module attributes {stable_mosaic.version = 11 : i64} {
  func.func @_y_dequantize_kernel(%arg0: i32, %arg1: memref<8x128xf32, #tpu.memory_space<vmem>>, %arg2: memref<8x128xf32, #tpu.memory_space<vmem>>, %arg3: memref<8x128xf32, #tpu.memory_space<vmem>>) attributes {dimension_semantics = [#tpu.dimension_semantics<parallel>], iteration_bounds = array<i64: 2>, scalar_prefetch = 0 : i64, scratch_operands = 0 : i64, tpu.core_type = #tpu.core_type<tc>, window_params = [{transform_indices = @transform_0, window_bounds = array<i64: 8, 128>}, {pipeline_mode = #tpu.pipeline_mode<synchronous>, transform_indices = @transform_1, window_bounds = array<i64: 8, 128>}, {transform_indices = @transform_2, window_bounds = array<i64: 8, 128>}]} {
    %c0 = arith.constant 0 : index
    %c0_0 = arith.constant 0 : index
    %0 = vector.load %arg1[%c0, %c0_0] : memref<8x128xf32, #tpu.memory_space<vmem>>, vector<8x128xf32>
    %c0_1 = arith.constant 0 : index
    %c0_2 = arith.constant 0 : index
    %1 = vector.load %arg2[%c0_1, %c0_2] : memref<8x128xf32, #tpu.memory_space<vmem>>, vector<1x128xf32>
    %2 = vector.broadcast %1 : vector<1x128xf32> to vector<8x128xf32>
    %3 = arith.mulf %0, %2 : vector<8x128xf32>
    %c0_3 = arith.constant 0 : index
    %c0_4 = arith.constant 0 : index
    %4 = vector.load %arg3[%c0_3, %c0_4] : memref<8x128xf32, #tpu.memory_space<vmem>>, vector<8x128xf32>
    tpu.vector_store %arg3[%c0_3, %c0_4], %3 {strides = array<i32>} : memref<8x128xf32, #tpu.memory_space<vmem>>, vector<8x128xf32>,
    return
  }
  func.func @transform_0(%arg0: i32) -> (i32, i32) {
    %c0_i32 = arith.constant 0 : i32
    %c0_i32_0 = arith.constant 0 : i32
    return %arg0, %c0_i32 : i32, i32
  }
  func.func @transform_1(%arg0: i32) -> (i32, i32) {
    %c0_i32 = arith.constant 0 : i32
    %c0_i32_0 = arith.constant 0 : i32
    %c0_i32_1 = arith.constant 0 : i32
    return %c0_i32, %c0_i32_0 : i32, i32
  }
  func.func @transform_2(%arg0: i32) -> (i32, i32) {
    %c0_i32 = arith.constant 0 : i32
    %c0_i32_0 = arith.constant 0 : i32
    return %arg0, %c0_i32 : i32, i32
  }
}

</mosaic_0001>

<bundles_post_ra>
// kernel: tpu_custom_call.1
= control target key start
LH: loop header
LB: loop body
LE: loop exit
PB: predicated region body
PF: predicated region fallthrough
CT: control target
= control target key end

     0   :  { %7 = vsyncpa [#allocation3], 0  ;;  %s654_s0 = inlined_call_operand.hbm [shape: f32[16,128], index: 0, kind: input, shape index: {}]   ;;  %s655_s1 = inlined_call_operand.hbm [shape: f32[8,128], index: 1, kind: input, shape index: {}]   ;;  %s656_s2 = inlined_call_operand.hbm [shape: f32[16,128], index: 2, kind: output, shape index: {}]  }
   0x1   :  { %9 = vsyncpa [#allocation3 + $0x1], 0 }
   0x2   :  { %10 = vsyncpa [#allocation6], 0 }
   0x3   :  { %11 = vsyncpa [#allocation4], 0 }
   0x4   :  { %13 = vsyncpa [#allocation4 + $0x1], 0  ;;  %s488_s9 = smov 0   ;;  %s490_s10 = smov 0  }
   0x5   :  { %s492_s11 = smov 0   ;;  %s494_s12 = smov 0  }
   0x6 LB: > { %s509_s13 = sadd.s32 4294967295, %s468_s12   ;;  %s274_s14 = sadd.s32 4294967294, %s468_s12   ;;  %s468_s12 = sphi %s494_s12, %s679_s12   ;;  %s464_s11 = sphi %s492_s11, %s678_s11   ;;  %s460_s10 = sphi %s490_s10, %s677_s10   ;;  %s456_s9 = sphi %s488_s9, %s676_s9  }
   0x7   : > { %p39_p0 = scmp.ne.s32.totalorder %s460_s10, %s456_s9  ;;  %p657_p1 = scmp.eq.s32.totalorder %s509_s13, 0 }
   0x8   : > { %p90_p3 = scmp.eq.s32.totalorder %s274_s14, 1  ;;  %p275_p5 = scmp.ge.s32.totalorder %s468_s12, 1 }
   0x9   : > { %p518_p4 = por %p657_p1, %p39_p0  ;;  %p97_p7 = scmp.lt.s32.totalorder %s468_s12, 3 }
   0xa   : > { %p523_p6 = por %p90_p3, %p39_p0  ;;  %s470_s18 = smov [#allocation5]  }
   0xb   : > { %s661_s15 = scalar_select %p518_p4, 1, 0 }
   0xc   : > { %s662_s16 = scalar_select %p523_p6, 1, 0 }
   0xd   : > { %p528_p8 = pnand %p275_p5, %p97_p7  ;;  %s110_s19 = sshll.u32 %s470_s18, 4  ;;  %s111_s19 = int_to_ptr.vmem [resolvable:$true] %s110_s19 }
   0xe   : > { %s536_s20 = sadd.s32 1, %s468_s12   ;;  %s26_s24 = sadd.s32 1, %s464_s11 }
   0xf   : > { %s663_s17 = scalar_select %p528_p8, 1, 0 }
  0x10   : > { %p297_p10 = pneg %p528_p8  ;;  %s23_s22 = ssub.s32 %s468_s12, %s536_s20 }
  0x11   : > { %p546_p12 = scmp.eq.s32.totalorder %s23_s22, 0  ;;  %p33_p13 = scmp.ne.s32.totalorder %s464_s11, %s460_s10 }
  0x12   : > { %p540_p11 = pnand %p297_p10, %p657_p1  ;;  %s357_s25 = scalar_lea.vmem %s111_s19, 128 }
  0x13   : > { %p358_p3 = scmp.ne.s32.totalorder %s111_s19, %s357_s25  ;;  %p365_p9 = scmp.lt.s32.totalorder %s111_s19, %s111_s19 }
  0x14   : > { %p348_p0 = pneg %p540_p11  ;;  %p366_p2 = scmp.lt.s32.totalorder %s357_s25, %s357_s25 }
  0x16   : > { %p360_p5 = pnand %p358_p3, %p348_p0  ;;  %p367_p10 = por %p366_p2, %p365_p9 }
  0x18   : > { %p361_p7 = pneg %p360_p5 }
  0x1a   : > { %p368_p1 = pnand %p367_p10, %p361_p7 }
  0x1c   : > { %371 = shalt.err (!%p368_p1)
}
  0x1d   : > { %300 = dma.hbm_to_vmem [thread:$0]  (!%p540_p11), %s655_s1, 128, %s111_s19, [#allocation6]  }
  0x1e   : > { %s563_s28 = scalar_select %p546_p12, %s464_s11, %s26_s24  }
  0x1f   : > { %p34_p1 = scmp.eq.s32.totalorder %s468_s12, 0  ;;  %p666_p2 = scmp.eq.s32.totalorder %s509_s13, 1 }
  0x20   : > { %p310_p0 = scmp.lt.s32.totalorder %s468_s12, 2  ;;  %s121_s30 = sand.u32 1, %s464_s11  }
  0x21   : > { %p571_p9 = por %p666_p2, %p33_p13  ;;  %p35_p3 = por %p34_p1, %p33_p13 }
  0x22   : > { %s278_s3 = sshll.u32 %s121_s30, 3  ;;  %s279_s4 = sshll.u32 %s468_s12, 7 }
  0x23   : > { %s667_s29 = scalar_select %p571_p9, 1, 0 }
  0x24   : > { %s584_s7 = scalar_lea.hbm %s654_s0, %s279_s4  ;;  %s125_s8 = scalar_lea.vmem [#allocation2], %s278_s3 }
  0x25   : > { %s132_s14 = sshll.u32 %s125_s8, 4  ;;  %p586_p11 = pnand %p310_p0, %p35_p3  ;;  %s133_s14 = int_to_ptr.vmem [resolvable:$true] %s132_s14 }
  0x26   : > { %s122_s19 = scalar_lea.sflag [#allocation3], %s121_s30  ;;  %s372_s21 = scalar_lea.hbm %s584_s7, 128 }
  0x27   : > { %p373_p12 = scmp.ne.s32.totalorder %s584_s7, %s372_s21  ;;  %p374_p13 = pneg %p586_p11 }
  0x28   : > { %s377_s24 = scalar_lea.hbm %s654_s0, 256  ;;  %p378_p10 = scmp.lt.s32.totalorder %s584_s7, %s654_s0 }
  0x29   : > { %p375_p5 = pnand %p374_p13, %p373_p12  ;;  %p379_p1 = scmp.lt.s32.totalorder %s377_s24, %s372_s21 }
  0x2b   : > { %p376_p7 = pneg %p375_p5  ;;  %p380_p2 = por %p379_p1, %p378_p10 }
  0x2d   : > { %p381_p0 = pnand %p380_p2, %p376_p7 }
  0x2f   : > { %384 = shalt.err (!%p381_p0)
}
  0x30   : > { %s385_s27 = scalar_lea.vmem %s133_s14, 128  ;;  %s471_s30 = smov [#allocation2]  }
  0x31   : > { %p386_p3 = scmp.ne.s32.totalorder %s133_s14, %s385_s27  ;;  %s390_s3 = sshll.u32 %s471_s30, 4  ;;  %s391_s3 = int_to_ptr.vmem [resolvable:$false] %s390_s3 }
  0x32   : > { %s392_s4 = scalar_lea.vmem %s391_s3, 256  ;;  %p393_p12 = scmp.lt.s32.totalorder %s133_s14, %s391_s3 }
  0x33   : > { %p388_p6 = pnand %p386_p3, %p374_p13  ;;  %p394_p5 = scmp.lt.s32.totalorder %s392_s4, %s385_s27 }
  0x35   : > { %p389_p9 = pneg %p388_p6  ;;  %p395_p4 = por %p394_p5, %p393_p12 }
  0x37   : > { %p396_p8 = pnand %p395_p4, %p389_p9 }
  0x39   : > { %399 = shalt.err (!%p396_p8)
}
  0x3a   : > { %304 = dma.hbm_to_vmem [thread:$0]  (!%p586_p11), %s584_s7, 128, %s133_s14, %s122_s19  }
  0x3b   : > { %p669_p7 = scmp.ne.s32.totalorder %s663_s17, 0 }
  0x3c   : > { %s607_s5 = sand.u32 (!%p669_p7), 1, %s460_s10   ;;  %p670_p6 = scmp.ne.s32.totalorder (!%p669_p7), %s661_s15, 0 }
  0x3d   : > { %141 = sbr.rel (%p669_p7) target bundleno = 95 (0x5f), region = 28  ;;  %s281_s6 = sshll.u32 (!%p669_p7), %s607_s5, 3 }
  0x3e   : > { %s144_s8 = scalar_lea.sflag (!%p669_p7), [#allocation3], %s607_s5  ;;  %s147_s21 = scalar_lea.vmem (!%p669_p7), [#allocation2], %s281_s6 }
  0x42   : > { %443 = dma.done.wait (%p670_p6), %s144_s8, 128  }
  0x43   : > { %445 = vsyncadd (%p670_p6), %s144_s8, 4294967168  ;;  %p671_p4 = scmp.eq.s32.totalorder %s509_s13, 0 }
  0x45   : > { %447 = dma.done.wait (%p671_p4), [#allocation6], 128   ;;  %p672_p8 = pmov %p671_p4 }
  0x46   : > { %s171_s17 = scalar_lea.vmem [#allocation7], %s281_s6  ;;  %s286_s14 = sshll.u32 %s509_s13, 7  ;;  %v172_v0 = vld [vmem:[%s147_s21] sm:$0xff]  ;;  %v284_v1 = vld [vmem:[#allocation5] ss:$0 sm:$0xff] }
  0x47   : > { %449 = vsyncadd (%p672_p8), [#allocation6], 4294967168  ;;  %s194_s7 = sshll.u32 %s171_s17, 4  ;;  %v178_v2 = vmul.f32 %v284_v1, %v172_v0  ;;  %s192_s15 = scalar_lea.hbm %s656_s2, %s286_s14  ;;  %s195_s7 = int_to_ptr.vmem [resolvable:$true] %s194_s7 }
  0x48   : > { %s181_s22 = scalar_lea.sflag [#allocation4], %s607_s5  ;;  %s400_s23 = scalar_lea.vmem %s195_s7, 128 }
  0x49   : > { %179 = vst [vmem:[%s171_s17] sm:$0xff] %v178_v2  ;;  %p401_p9 = scmp.ne.s32.totalorder %s195_s7, %s400_s23  ;;  %p673_p11 = scmp.ne.s32.totalorder %s667_s29, 0 }
  0x4a   : > { %s472_s24 = smov [#allocation7]  }
  0x4b   : > { %p402_p13 = pnand %p401_p9, %p673_p11  ;;  %s404_s25 = sshll.u32 %s472_s24, 4  ;;  %s405_s25 = int_to_ptr.vmem [resolvable:$false] %s404_s25 }
  0x4c   : > { %s406_s26 = scalar_lea.vmem %s405_s25, 256  ;;  %p407_p1 = scmp.lt.s32.totalorder %s195_s7, %s405_s25 }
  0x4d   : > { %p403_p10 = pneg %p402_p13  ;;  %p408_p2 = scmp.lt.s32.totalorder %s406_s26, %s400_s23 }
  0x4f   : > { %p409_p0 = por %p408_p2, %p407_p1 }
  0x51   : > { %p410_p3 = pnand %p409_p0, %p403_p10 }
  0x53   : > { %413 = shalt.err (!%p410_p3)
}
  0x54   : > { %s414_s13 = scalar_lea.hbm %s192_s15, 128  ;;  %s418_s3 = scalar_lea.hbm %s656_s2, 256 }
  0x55   : > { %p415_p12 = scmp.ne.s32.totalorder %s192_s15, %s414_s13  ;;  %p419_p6 = scmp.lt.s32.totalorder %s192_s15, %s656_s2 }
  0x56   : > { %p420_p4 = scmp.lt.s32.totalorder %s418_s3, %s414_s13 }
  0x57   : > { %p416_p5 = pnand %p415_p12, %p673_p11 }
  0x58   : > { %p421_p8 = por %p420_p4, %p419_p6 }
  0x59   : > { %p417_p7 = pneg %p416_p5 }
  0x5b   : > { %p422_p9 = pnand %p421_p8, %p417_p7 }
  0x5d   : > { %425 = shalt.err (!%p422_p9)
}
  0x5e   : > { %295 = dma.vmem_to_hbm [thread:$0]  (%p673_p11), %s195_s7, 128, %s192_s15, %s181_s22  }
  0x5f PF: > { %s206_s6 = sand.u32 1, %s456_s9   ;;  %p674_p13 = scmp.ne.s32.totalorder %s662_s16, 0 }
  0x60   : > { %p675_p10 = scmp.ge.s32.totalorder %s468_s12, 2  ;;  %s207_s8 = scalar_lea.sflag [#allocation4], %s206_s6 }
  0x62   : > { %p306_p1 = pnand %p675_p10, %p674_p13 }
  0x64   : > { %p307_p2 = pneg %p306_p1 }
  0x66   : > { %451 = dma.done.wait (%p307_p2), %s207_s8, 128  }
  0x67   : > { %453 = vsyncadd (%p307_p2), %s207_s8, 4294967168  ;;  %p16_p0 = scmp.ge.s32.totalorder %s536_s20, 4   ;;  %s676_s9 = smov %s460_s10 }
  0x68   : > { %s677_s10 = smov %s464_s11  ;;  %s678_s11 = smov %s563_s28 }
  0x69   : > { %s679_s12 = smov %s536_s20  ;;  %18 = sbr.rel (!%p16_p0) target bundleno = 6 (0x6), region = 77 }
  0x6e   :  { %212 = vsyncpa [#allocation3], 1 }
  0x6f   :  { %214 = vsyncpa [#allocation3 + $0x1], 1 }
  0x70   :  { %215 = vsyncpa [#allocation6], 1 }
  0x71   :  { %216 = vsyncpa [#allocation4], 1 }
  0x72   :  { %218 = vsyncpa [#allocation4 + $0x1], 1 }

</bundles_post_ra>
